<compile_context>
chip_gen: v6e
topology: v6e:2x2x1
jax: 0.10.0
libtpu: 0.0.40
codegen_flags: <defaults>
</compile_context>

<pallas_src>
import functools

import jax
import jax.numpy as jnp
from jax.experimental import pallas as pl
from jax.experimental.pallas import tpu as pltpu

_LANE_COLS = 1024               # lane-dense slab width (multiple of 128; 8 f32 vregs/row-group)
_TINY_BYTES = 32 << 10          # below this: pure-XLA sum (kernel launch not worth it)
_FAST_PATH_BYTES = 512 << 10    # below this: single-block kernel
_VMEM_LIMIT_BYTES = 32 << 20    # explicit scoped-VMEM budget (safe on v5e/v6e/v7x)


def _auto_block_bytes():
    """Per-generation streaming tile size; ~8 MiB on v7x-class chips, ~4 MiB otherwise."""
    try:
        info = pltpu.get_tpu_info()
        vmem = int(getattr(info, "vmem_capacity_bytes", 0) or 0)
        if 0 < vmem <= (64 << 20):      # v7x: 64 MiB VMEM but ~3.2 TB/s HBM -> bigger tiles
            return 8 << 20
    except Exception:
        pass
    return 4 << 20


def _sum_all_kernel(m_ref, out_ref):
    # Whole (small) mask in one block: widen on the VPU and reduce once.
    out_ref[0, 0] = jnp.sum(m_ref[...].astype(jnp.float32))


def _tiled_sum_kernel(m_ref, out_ref, acc_ref, *, tail_rows):
    t = pl.program_id(0)
    nt = pl.num_programs(0)
    tile_rows, cols = m_ref.shape

    @pl.when(t == 0)
    def _init():
        acc_ref[...] = jnp.zeros_like(acc_ref)

    def _partial(blk):
        # (tile_rows, cols) -> (tile_rows//8, 8, cols) is sublane-group aligned (tile_rows
        # is a multiple of 32), so the leading-axis sum is pure VPU adds into 8 x cols.
        return blk.reshape(tile_rows // 8, 8, cols).sum(axis=0)

    if tail_rows:
        @pl.when(t < nt - 1)
        def _full_tile():
            acc_ref[...] += _partial(m_ref[...].astype(jnp.float32))

        @pl.when(t == nt - 1)
        def _tail_tile():
            blk = m_ref[...].astype(jnp.float32)
            rid = jax.lax.broadcasted_iota(jnp.int32, blk.shape, 0)
            # Select (not multiply) so garbage/NaN padding in the ragged block cannot leak.
            acc_ref[...] += _partial(jnp.where(rid < tail_rows, blk, 0.0))
    else:
        acc_ref[...] += _partial(m_ref[...].astype(jnp.float32))

    @pl.when(t == nt - 1)
    def _finalize():
        out_ref[0, 0] = jnp.sum(acc_ref[...])


def _mask_sum_2d(mat, *, fast_path_bytes, target_block_bytes):
    """Sum of all elements of a lane-dense 2-D slab, accumulated in f32 by a Pallas kernel."""
    rows, cols = mat.shape
    itemsize = mat.dtype.itemsize
    total_bytes = rows * cols * itemsize

    if target_block_bytes is None:
        target_block_bytes = _auto_block_bytes()
    # 32-row alignment is layout-clean for f32/bf16/int8/fp8 sublane packing.
    tile_rows = max(32, (target_block_bytes // (cols * itemsize)) // 32 * 32)

    params = pltpu.CompilerParams(dimension_semantics=("arbitrary",),
                                  vmem_limit_bytes=_VMEM_LIMIT_BYTES)

    if total_bytes <= fast_path_bytes or tile_rows >= rows:
        out = pl.pallas_call(
            _sum_all_kernel,
            out_shape=jax.ShapeDtypeStruct((1, 1), jnp.float32),
            grid=(1,),
            in_specs=[pl.BlockSpec((rows, cols), lambda i: (0, 0))],
            out_specs=pl.BlockSpec((1, 1), lambda i: (0, 0), memory_space=pltpu.SMEM),
            compiler_params=params,
            cost_estimate=pl.CostEstimate(flops=rows * cols, transcendentals=0,
                                          bytes_accessed=total_bytes + 4),
        )(mat)
        return out[0, 0]

    num_tiles = -(-rows // tile_rows)
    tail_rows = rows % tile_rows
    kernel = functools.partial(_tiled_sum_kernel, tail_rows=tail_rows)

    out = pl.pallas_call(
        kernel,
        out_shape=jax.ShapeDtypeStruct((1, 1), jnp.float32),
        grid=(num_tiles,),
        in_specs=[pl.BlockSpec((tile_rows, cols), lambda t: (t, 0))],
        out_specs=pl.BlockSpec((1, 1), lambda t: (0, 0), memory_space=pltpu.SMEM),
        scratch_shapes=[pltpu.VMEM((8, cols), jnp.float32)],
        compiler_params=params,
        cost_estimate=pl.CostEstimate(flops=rows * cols, transcendentals=0,
                                      bytes_accessed=total_bytes + 4),
    )(mat)
    return out[0, 0]


def _mask_sum_flat(flat, *, tiny_bytes, fast_path_bytes, target_block_bytes):
    n = flat.size
    total_bytes = n * flat.dtype.itemsize

    # Tiny-mask bail-out: kernel launch + DMA setup dwarfs the work.
    if total_bytes <= tiny_bytes or n < _LANE_COLS:
        return jnp.sum(flat.astype(jnp.float32))

    cols = _LANE_COLS
    rows = n // cols
    main = flat[: rows * cols].reshape(rows, cols)      # lane-dense (rows, 1024) slab
    total = _mask_sum_2d(main, fast_path_bytes=fast_path_bytes,
                         target_block_bytes=target_block_bytes)
    rem = n - rows * cols
    if rem:
        total = total + jnp.sum(flat[rows * cols:].astype(jnp.float32))
    return total


def size_mask_loss_ss(src, times, smoother_stats, mask, *, mean=True, target_val=None,
                      tiny_bytes=_TINY_BYTES, fast_path_bytes=_FAST_PATH_BYTES,
                      target_block_bytes=None):
    """JAX/Pallas equivalent of SizeMaskLoss_SS.forward. Returns a scalar f32."""
    del src, times, smoother_stats          # unused by the reference forward pass
    mask = jnp.asarray(mask)
    denom = float(mask.size) if mean else float(mask.shape[0])

    flat = mask.reshape(-1)                 # row-major flatten (layout plumbing, no compute)
    total = _mask_sum_flat(flat, tiny_bytes=tiny_bytes, fast_path_bytes=fast_path_bytes,
                           target_block_bytes=target_block_bytes)
    val = total / jnp.float32(denom)
    if target_val is not None:
        # sqrt((x - t)^2) == |x - t|: avoid the scalar sqrt.
        val = jnp.abs(val - jnp.float32(target_val))
    return val


def _reference(mask, *, mean=True, target_val=None):
    m = jnp.asarray(mask).astype(jnp.float32)
    v = m.mean() if mean else m.sum() / mask.shape[0]
    if target_val is not None:
        v = jnp.sqrt((v - jnp.float32(target_val)) ** 2)
    return v


if __name__ == "__main__":
    key = jax.random.PRNGKey(0)
    k1, k2, k3, k4, k5, k6, k7, k8 = jax.random.split(key, 8)

    # Small shapes implied by the module's forward: (B, T, D) src, (B, T) mask.
    B, T, D = 2, 8, 4
    src = jax.random.normal(k1, (B, T, D), dtype=jnp.float32)
    times = jnp.broadcast_to(jnp.arange(T, dtype=jnp.float32), (B, T))
    smoother_stats = (
        jax.random.uniform(k2, (B, T), dtype=jnp.float32),
        jax.random.uniform(k3, (B, T), dtype=jnp.float32),
    )

    failures = []

    def _check(tag, got, want, rtol=1e-5):
        if not jnp.allclose(got, want, rtol=rtol, atol=1e-5):
            failures.append(tag)
            print(f"MISMATCH {tag}: {got} vs {want}")

    # 1) Tiny-mask bail-out (pure XLA): the module's realistic (B, T) mask, all 4 configs.
    mask_tiny = jax.random.uniform(k4, (B, T), dtype=jnp.float32)
    for mean, tv in [(True, None), (True, 0.3), (False, None), (False, 0.3)]:
        got = jax.block_until_ready(
            size_mask_loss_ss(src, times, smoother_stats, mask_tiny, mean=mean, target_val=tv))
        want = _reference(mask_tiny, mean=mean, target_val=tv)
        _check(f"tiny mean={mean} target={tv}", got, want)

    # 2) Fast path: ~50 KiB mask -> single-block Pallas kernel (defaults), with lane remainder.
    mask_fast = jax.random.uniform(k5, (64, 200), dtype=jnp.float32)
    for mean, tv in [(True, None), (False, 0.3)]:
        got = jax.block_until_ready(
            size_mask_loss_ss(src, times, smoother_stats, mask_fast, mean=mean, target_val=tv))
        want = _reference(mask_fast, mean=mean, target_val=tv)
        _check(f"fast mean={mean} target={tv}", got, want)

    # 3) Streaming path (forced via small thresholds): ragged row tail + flat remainder,
    #    f32 and bf16, plus an evenly tiled case with no tail.
    stream_kwargs = dict(tiny_bytes=0, fast_path_bytes=0, target_block_bytes=32 * 1024 * 4)
    mask_f32 = jax.random.uniform(k6, (300, 200), dtype=jnp.float32)
    mask_bf16 = jax.random.uniform(k7, (600, 200), dtype=jnp.float32).astype(jnp.bfloat16)
    mask_even = jax.random.uniform(k8, (512, 256), dtype=jnp.float32)
    for tag, m, mean, tv in [
        ("stream-f32-mean", mask_f32, True, 0.25),
        ("stream-f32-sum", mask_f32, False, None),
        ("stream-bf16-mean", mask_bf16, True, None),
        ("stream-even-mean", mask_even, True, None),
    ]:
        got = jax.block_until_ready(
            size_mask_loss_ss(src, times, smoother_stats, m,
                              mean=mean, target_val=tv, **stream_kwargs))
        want = _reference(m, mean=mean, target_val=tv)
        _check(tag, got, want, rtol=1e-4)

    # 4) Streaming path with auto (per-chip) tile size on a multi-MiB mask.
    mask_big = jax.random.uniform(k8, (2048, 1024), dtype=jnp.float32)
    got = jax.block_until_ready(
        size_mask_loss_ss(src, times, smoother_stats, mask_big, mean=True, target_val=0.5))
    want = _reference(mask_big, mean=True, target_val=0.5)
    _check("auto-big-mean", got, want, rtol=1e-4)

    if not failures:
        print("KERNEL_OK")
</pallas_src>

<mosaic_0001>
module attributes {stable_mosaic.version = 11 : i64} {
  func.func @_sum_all_kernel(%arg0: i32, %arg1: memref<12x1024xf32, #tpu.memory_space<vmem>>, %arg2: memref<1x1xf32, #tpu.memory_space<smem>>) attributes {dimension_semantics = [#tpu.dimension_semantics<arbitrary>], iteration_bounds = array<i64: 1>, scalar_prefetch = 0 : i64, scratch_operands = 0 : i64, tpu.core_type = #tpu.core_type<tc>, window_params = [{pipeline_mode = #tpu.pipeline_mode<synchronous>, transform_indices = @transform_0, window_bounds = array<i64: 12, 1024>}, {transform_indices = @transform_1, window_bounds = array<i64: 1, 1>}]} {
    %c0 = arith.constant 0 : index
    %c0_0 = arith.constant 0 : index
    %0 = vector.load %arg1[%c0, %c0_0] : memref<12x1024xf32, #tpu.memory_space<vmem>>, vector<12x1024xf32>
    %1 = vector.shape_cast %0 : vector<12x1024xf32> to vector<1x12x1024xf32>
    %cst = arith.constant dense<0.000000e+00> : vector<1xf32>
    %2 = vector.multi_reduction <add>, %1, %cst [1, 2] : vector<1x12x1024xf32> to vector<1xf32>
    %3 = vector.shape_cast %2 : vector<1xf32> to vector<1x1x1xf32>
    %4 = vector.extract %3[0, 0, 0] : f32 from vector<1x1x1xf32>
    %c0_1 = arith.constant 0 : index
    %c0_2 = arith.constant 0 : index
    %5 = memref.load %arg2[%c0_1, %c0_2] : memref<1x1xf32, #tpu.memory_space<smem>>
    memref.store %4, %arg2[%c0_1, %c0_2] : memref<1x1xf32, #tpu.memory_space<smem>>
    return
  }
  func.func @transform_0(%arg0: i32) -> (i32, i32) {
    %c0_i32 = arith.constant 0 : i32
    %c0_i32_0 = arith.constant 0 : i32
    %c0_i32_1 = arith.constant 0 : i32
    return %c0_i32, %c0_i32_0 : i32, i32
  }
  func.func @transform_1(%arg0: i32) -> (i32, i32) {
    %c0_i32 = arith.constant 0 : i32
    %c0_i32_0 = arith.constant 0 : i32
    %c0_i32_1 = arith.constant 0 : i32
    return %c0_i32, %c0_i32_0 : i32, i32
  }
}

</mosaic_0001>

<bundles_post_ra>
// kernel: tpu_custom_call.1
= control target key start
LH: loop header
LB: loop body
LE: loop exit
PB: predicated region body
PF: predicated region fallthrough
CT: control target
= control target key end

     0   :  { %6 = vsyncpa [#allocation3], 0  ;;  %s154_s0 = inlined_call_operand.hbm [shape: f32[12,1024], index: 0, kind: input, shape index: {}]   ;;  %s155_s1 = inlined_call_operand.hbm [shape: f32[1,1], index: 1, kind: output, shape index: {}]  }
   0x1   :  { %7 = vsyncpa [#allocation4], 0  ;;  %s126_s6 = smov [#allocation2]  }
   0x2   :  { %s13_s7 = sshll.u32 %s126_s6, 4  ;;  %s14_s7 = int_to_ptr.vmem [resolvable:$true] %s13_s7 }
   0x3   :  { %s102_s8 = scalar_lea.vmem %s14_s7, 2048  ;;  %p107_p1 = scmp.lt.s32.totalorder %s14_s7, %s14_s7 }
   0x4   :  { %p103_p0 = scmp.ne.s32.totalorder %s14_s7, %s102_s8  ;;  %p108_p2 = scmp.lt.s32.totalorder %s102_s8, %s102_s8 }
   0x6   :  { %p109_p3 = por %p108_p2, %p107_p1 }
   0x8   :  { %p110_p4 = pnand %p109_p3, %p103_p0 }
   0xa   :  { %113 = shalt.err (!%p110_p4)
}
   0xb   :  { %s127_s9 = smov 1024   ;;  %s128_s10 = smov 64  }
   0xc   :  { %19 = dma.hbm_to_vmem [thread:$0]  %s154_s0, 2048, %s14_s7, [#allocation3], %s127_s9, %s127_s9, %s128_s10  }
   0xd   :  { %122 = dma.done.wait [#allocation3], 2048  }
   0xe   :  { %123 = vsyncadd [#allocation3], 4294965248  ;;  %v23_v0 = vld [vmem:[#allocation2] sm:$0xff]  ;;  %v24_v1 = vld [vmem:[#allocation2 + $0x8] sm:$0xff]  ;;  %vm46_vm0 = vcmask 1043456   ;;  %s129_s13 = smov [#allocation5]  }
   0xf   :  { %v25_v2 = vld [vmem:[#allocation2 + $0x10] sm:$0xff]  ;;  %v39_v3 = vadd.f32 %v24_v1, %v23_v0  ;;  %v26_v4 = vld [vmem:[#allocation2 + $0x18] sm:$0xff]  ;;  %v27_v6 = vld [vmem:[#allocation2 + $0x20] sm:$0xff] }
  0x10   :  { %v28_v8 = vld [vmem:[#allocation2 + $0x28] sm:$0xff]  ;;  %v29_v10 = vld [vmem:[#allocation2 + $0x30] sm:$0xff]  ;;  %v31_v11 = vld [vmem:[#allocation2 + $0x40] sm:$0xf] }
  0x11   :  { %v40_v5 = vadd.f32 %v39_v3, %v25_v2  ;;  %v30_v13 = vld [vmem:[#allocation2 + $0x38] sm:$0xff]  ;;  %v32_v14 = vld [vmem:[#allocation2 + $0x48] sm:$0xf]  ;;  %v47_v16 = vsel %vm46_vm0, %v31_v11, 0.0  ;;  %v33_v17 = vld [vmem:[#allocation2 + $0x50] sm:$0xf] }
  0x12   :  { %v49_v19 = vsel %vm46_vm0, %v32_v14, 0.0  ;;  %v34_v20 = vld [vmem:[#allocation2 + $0x58] sm:$0xf]  ;;  %v51_v22 = vsel %vm46_vm0, %v33_v17, 0.0  ;;  %v35_v23 = vld [vmem:[#allocation2 + $0x60] sm:$0xf] }
  0x13   :  { %v41_v7 = vadd.f32 %v40_v5, %v26_v4  ;;  %v53_v25 = vsel %vm46_vm0, %v34_v20, 0.0  ;;  %v36_v26 = vld [vmem:[#allocation2 + $0x68] sm:$0xf]  ;;  %v55_v28 = vsel %vm46_vm0, %v35_v23, 0.0  ;;  %v37_v29 = vld [vmem:[#allocation2 + $0x70] sm:$0xf] }
  0x14   :  { %v57_v31 = vsel %vm46_vm0, %v36_v26, 0.0  ;;  %v38_v32 = vld [vmem:[#allocation2 + $0x78] sm:$0xf]  ;;  %v59_v34 = vsel %vm46_vm0, %v37_v29, 0.0 }
  0x15   :  { %v42_v9 = vadd.f32 %v41_v7, %v27_v6  ;;  %v61_v36 = vsel %vm46_vm0, %v38_v32, 0.0 }
  0x17   :  { %v43_v12 = vadd.f32 %v42_v9, %v28_v8 }
  0x19   :  { %v44_v15 = vadd.f32 %v43_v12, %v29_v10 }
  0x1b   :  { %v45_v18 = vadd.f32 %v44_v15, %v30_v13 }
  0x1d   :  { %v48_v21 = vadd.f32 %v47_v16, %v45_v18 }
  0x1f   :  { %v50_v24 = vadd.f32 %v49_v19, %v48_v21 }
  0x21   :  { %v52_v27 = vadd.f32 %v51_v22, %v50_v24 }
  0x23   :  { %v54_v30 = vadd.f32 %v53_v25, %v52_v27 }
  0x25   :  { %v56_v33 = vadd.f32 %v55_v28, %v54_v30 }
  0x27   :  { %v58_v35 = vadd.f32 %v57_v31, %v56_v33 }
  0x29   :  { %v60_v37 = vadd.f32 %v59_v34, %v58_v35 }
  0x2b   :  { %v62_v38 = vadd.f32 %v61_v36, %v60_v37 }
  0x2d   :  { %63 = vadd.xlane.f32.xlu0 %v62_v38 }
  0xb6   :  { %v64_v39 = vpop.xlane.xlu0 %63 }
  0xb7   :  { %v65_v40 = vrot.slane %v64_v39, 4 }
  0xb9   :  { %v66_v41 = vadd.f32 %v65_v40, %v64_v39 }
  0xbb   :  { %v67_v42 = vrot.slane %v66_v41, 2 }
  0xbd   :  { %v68_v43 = vadd.f32 %v67_v42, %v66_v41 }
  0xbf   :  { %v69_v44 = vrot.slane %v68_v43, 1 }
  0xc1   :  { %v70_v45 = vadd.f32 %v69_v44, %v68_v43 }
  0xc3   :  { %88 = vpush %v70_v45 }
  0xf4   :  { %s89_s0 = spop %88 }
  0xf5   :  { %73 = sst [smem:[#allocation5]] %s89_s0 }
  0xf6   :  { %81 = dma.smem_to_hbm %s129_s13, 16, %s155_s1, [#allocation4]  }
  0xf7   :  { %124 = dma.done.wait [#allocation4], 16  }
  0xf8   :  { %125 = vsyncadd [#allocation4], 4294967280 }
  0xf9   :  { %85 = sfence }
  0xfa   :  { %86 = vsyncpa [#allocation3], 1 }
  0xfb   :  { %87 = vsyncpa [#allocation4], 1 }

</bundles_post_ra>
